<compile_context>
chip_gen: v6e
topology: v6e:2x2x1
jax: 0.10.0
libtpu: 0.0.40
codegen_flags: <defaults>
</compile_context>

<pallas_src>
import functools

import jax
import jax.numpy as jnp
from jax.experimental import pallas as pl
from jax.experimental.pallas import tpu as pltpu


# --------------------------------------------------------------------------
# Pallas kernel 1: weighted softmax cross-entropy, classes on sublanes,
# samples on lanes.  logits: (C, N); targets/weights: (1, N).  Accumulates
# sum_i w_i * nll_i and sum_i w_i.  Tail samples masked in-kernel (no host
# padding copies).
# --------------------------------------------------------------------------
def _wce_kernel(x_ref, t_ref, w_ref, lsum_ref, wsum_ref, acc_ref, *,
                n_total, tile_n):
    i = pl.program_id(0)

    @pl.when(i == 0)
    def _():
        acc_ref[0] = 0.0
        acc_ref[1] = 0.0

    x = x_ref[...].astype(jnp.float32)            # (C, TN)
    t = t_ref[...]                                # (1, TN) int32
    w = w_ref[...].astype(jnp.float32)            # (1, TN)

    m = jnp.max(x, axis=0, keepdims=True)         # (1, TN)
    lse = jnp.log(jnp.sum(jnp.exp(x - m), axis=0, keepdims=True)) + m
    cls = jax.lax.broadcasted_iota(jnp.int32, x.shape, 0)
    tgt_logit = jnp.sum(jnp.where(cls == t, x, 0.0), axis=0, keepdims=True)
    nll = lse - tgt_logit                         # (1, TN)

    col = jax.lax.broadcasted_iota(jnp.int32, (1, tile_n), 1) + i * tile_n
    valid = col < n_total
    wv = jnp.where(valid, w, 0.0)
    acc_ref[0] += jnp.sum(jnp.where(valid, wv * nll, 0.0))
    acc_ref[1] += jnp.sum(wv)

    @pl.when(i == pl.num_programs(0) - 1)
    def _():
        lsum_ref[0, 0] = acc_ref[0]
        wsum_ref[0, 0] = acc_ref[1]


def weighted_cross_entropy_cn(logits_cn, targets, weights, tile_n=4096):
    """F.cross_entropy with per-sample weights; logits laid out (classes, N)."""
    C, N = logits_cn.shape
    if N <= tile_n:
        tn, n_tiles = N, 1                        # full-dim block (no 128 pad)
    else:
        tn, n_tiles = tile_n, pl.cdiv(N, tile_n)  # tile_n is a mult of 128
    t2 = targets.astype(jnp.int32).reshape(1, N)
    w2 = weights.astype(jnp.float32).reshape(1, N)

    lsum, wsum = pl.pallas_call(
        functools.partial(_wce_kernel, n_total=N, tile_n=tn),
        out_shape=(jax.ShapeDtypeStruct((1, 1), jnp.float32),
                   jax.ShapeDtypeStruct((1, 1), jnp.float32)),
        grid_spec=pltpu.PrefetchScalarGridSpec(
            num_scalar_prefetch=0,
            grid=(n_tiles,),
            in_specs=[pl.BlockSpec((C, tn), lambda i: (0, i)),
                      pl.BlockSpec((1, tn), lambda i: (0, i)),
                      pl.BlockSpec((1, tn), lambda i: (0, i))],
            out_specs=[pl.BlockSpec((1, 1), lambda i: (0, 0),
                                    memory_space=pltpu.MemorySpace.SMEM),
                       pl.BlockSpec((1, 1), lambda i: (0, 0),
                                    memory_space=pltpu.MemorySpace.SMEM)],
            scratch_shapes=[pltpu.SMEM((2,), jnp.float32)]),
        compiler_params=pltpu.CompilerParams(
            dimension_semantics=("arbitrary",)),
    )(logits_cn, t2, w2)
    return lsum[0, 0] / jnp.maximum(wsum[0, 0], 1e-12)


# --------------------------------------------------------------------------
# Pallas kernel 2: fused bilinear-upsample + ignore-index cross-entropy.
# Low-res logits (C, h, w) stay resident in VMEM per batch item; each grid
# step upsamples a tile of output rows with two small matmuls per class
# (row-interp FIRST -> cheaper, no cross-tile recompute) and computes the
# softmax NLL without ever writing the upsampled logits to HBM.
# --------------------------------------------------------------------------
def _pixel_ce_kernel(low_ref, rh_ref, rwt_ref, tgt_ref, lsum_ref, wsum_ref,
                     acc_ref, *, num_classes, full_h, tile_h, ignore_index):
    j = pl.program_id(1)

    @pl.when(j == 0)
    def _():
        acc_ref[0] = 0.0
        acc_ref[1] = 0.0

    rh = rh_ref[...].astype(jnp.float32)          # (TH, h) row-interp weights
    rwt = rwt_ref[...].astype(jnp.float32)        # (w, W)  col-interp weights
    t = tgt_ref[0]                                # (TH, W) int32 labels

    # Bilinear upsample one class at a time (C is small: 4..19).  Row-interp
    # first: (TH,h)@(h,w) -> (TH,w), then (TH,w)@(w,W) -> (TH,W).  Both
    # matmuls depend on the row tile, so nothing is redundantly recomputed
    # across tiles, and FLOPs per tile are minimized (TH << H typically).
    ups = []
    for c in range(num_classes):
        low_c = low_ref[c].astype(jnp.float32)                            # (h, w)
        xr = jnp.dot(rh, low_c, preferred_element_type=jnp.float32)       # (TH, w)
        ups.append(jnp.dot(xr, rwt, preferred_element_type=jnp.float32))  # (TH, W)

    m = ups[0]
    for c in range(1, num_classes):
        m = jnp.maximum(m, ups[c])
    s = jnp.zeros_like(m)
    tgt_logit = jnp.zeros_like(m)
    for c in range(num_classes):
        s = s + jnp.exp(ups[c] - m)
        tgt_logit = tgt_logit + jnp.where(t == c, ups[c], 0.0)
    nll = jnp.log(s) + m - tgt_logit              # (TH, W)

    row = jax.lax.broadcasted_iota(jnp.int32, t.shape, 0) + j * tile_h
    valid = (t != ignore_index) & (row < full_h)
    acc_ref[0] += jnp.sum(jnp.where(valid, nll, 0.0))
    acc_ref[1] += jnp.sum(valid.astype(jnp.float32))

    @pl.when(j == pl.num_programs(1) - 1)
    def _():
        lsum_ref[0, 0] = acc_ref[0]
        wsum_ref[0, 0] = acc_ref[1]


def _interp_matrix(out_size, in_size):
    """Exact PyTorch F.interpolate(mode='bilinear', align_corners=False) as a
    (out_size, in_size) interpolation matrix."""
    scale = in_size / out_size
    dst = jnp.arange(out_size, dtype=jnp.float32)
    src = jnp.maximum((dst + 0.5) * scale - 0.5, 0.0)
    i0 = jnp.minimum(jnp.floor(src), in_size - 1).astype(jnp.int32)
    i1 = jnp.minimum(i0 + 1, in_size - 1)
    frac = src - i0.astype(jnp.float32)
    rows = jnp.arange(out_size)
    m = jnp.zeros((out_size, in_size), jnp.float32)
    m = m.at[rows, i0].add(1.0 - frac)
    m = m.at[rows, i1].add(frac)
    return m


def fused_upsample_cross_entropy(low_logits, sem_seg, ignore_index=255,
                                 tile_h=64):
    """== F.cross_entropy(F.interpolate(low_logits, (H,W), 'bilinear',
    align_corners=False), sem_seg, ignore_index=255) without materializing
    the upsampled logits."""
    B, C, h, w = low_logits.shape
    H, W = sem_seg.shape[-2:]
    rh = _interp_matrix(H, h)                     # (H, h)
    rwt = _interp_matrix(W, w).T                  # (w, W)
    tile_h = max(8, (tile_h // 8) * 8)
    th = H if H <= tile_h else tile_h
    n_row_tiles = pl.cdiv(H, th)
    low_flat = low_logits.reshape(B * C, h, w)    # free reshape (NCHW kept)
    tgt = sem_seg.astype(jnp.int32)               # (B, H, W)

    lsum, wsum = pl.pallas_call(
        functools.partial(_pixel_ce_kernel, num_classes=C, full_h=H,
                          tile_h=th, ignore_index=ignore_index),
        out_shape=(jax.ShapeDtypeStruct((B, 1), jnp.float32),
                   jax.ShapeDtypeStruct((B, 1), jnp.float32)),
        grid_spec=pltpu.PrefetchScalarGridSpec(
            num_scalar_prefetch=0,
            grid=(B, n_row_tiles),
            in_specs=[pl.BlockSpec((C, h, w), lambda b, j: (b, 0, 0)),
                      pl.BlockSpec((th, h), lambda b, j: (j, 0)),
                      pl.BlockSpec((w, W), lambda b, j: (0, 0)),
                      pl.BlockSpec((1, th, W), lambda b, j: (b, j, 0))],
            out_specs=[pl.BlockSpec((1, 1), lambda b, j: (b, 0),
                                    memory_space=pltpu.MemorySpace.SMEM),
                       pl.BlockSpec((1, 1), lambda b, j: (b, 0),
                                    memory_space=pltpu.MemorySpace.SMEM)],
            scratch_shapes=[pltpu.SMEM((2,), jnp.float32)]),
        compiler_params=pltpu.CompilerParams(
            dimension_semantics=("parallel", "arbitrary")),
    )(low_flat, rh, rwt, tgt)
    return jnp.sum(lsum) / jnp.maximum(jnp.sum(wsum), 1e-12)


# --------------------------------------------------------------------------
# Pallas kernel 3: fused sigmoid-CE + dice point losses, tiled over masks.
# Shares exp(-|x|) between the BCE softplus and the sigmoid; EUP-approx
# reciprocal for the sigmoid denominator.
# --------------------------------------------------------------------------
def _mask_loss_kernel(logit_ref, label_ref, bce_ref, dice_ref, acc_ref, *,
                      n_total, tile_n, inv_points):
    i = pl.program_id(0)

    @pl.when(i == 0)
    def _():
        acc_ref[0] = 0.0
        acc_ref[1] = 0.0

    x = logit_ref[...].astype(jnp.float32)        # (TN, P)
    t = label_ref[...].astype(jnp.float32)
    row = jax.lax.broadcasted_iota(jnp.int32, x.shape, 0) + i * tile_n
    valid = row < n_total
    x = jnp.where(valid, x, 0.0)                  # sanitize tail-tile garbage
    t = jnp.where(valid, t, 0.0)

    e = jnp.exp(-jnp.abs(x))                      # shared transcendental
    bce = jnp.maximum(x, 0.0) - x * t + jnp.log1p(e)
    bce_row = jnp.sum(bce, axis=1, keepdims=True) * inv_points     # (TN, 1)

    r = pl.reciprocal(1.0 + e, approx=True)
    p = jnp.where(x >= 0.0, r, e * r)             # sigmoid(x)
    numer = 2.0 * jnp.sum(p * t, axis=1, keepdims=True)
    denom = jnp.sum(p, axis=1, keepdims=True) + jnp.sum(t, axis=1, keepdims=True)
    dice_row = 1.0 - (numer + 1.0) / (denom + 1.0)                 # (TN, 1)

    row_valid = valid[:, 0:1]                     # reuse the tile validity mask
    acc_ref[0] += jnp.sum(jnp.where(row_valid, bce_row, 0.0))
    acc_ref[1] += jnp.sum(jnp.where(row_valid, dice_row, 0.0))

    @pl.when(i == pl.num_programs(0) - 1)
    def _():
        bce_ref[0, 0] = acc_ref[0]
        dice_ref[0, 0] = acc_ref[1]


def mask_point_losses(point_logits, point_labels, tile_masks=128):
    N, P = point_logits.shape
    if N == 0:
        return jnp.float32(0.0), jnp.float32(0.0)
    if N <= tile_masks:
        tn, n_tiles = N, 1
    else:
        tn, n_tiles = tile_masks, pl.cdiv(N, tile_masks)
    bce_sum, dice_sum = pl.pallas_call(
        functools.partial(_mask_loss_kernel, n_total=N, tile_n=tn,
                          inv_points=1.0 / P),
        out_shape=(jax.ShapeDtypeStruct((1, 1), jnp.float32),
                   jax.ShapeDtypeStruct((1, 1), jnp.float32)),
        grid_spec=pltpu.PrefetchScalarGridSpec(
            num_scalar_prefetch=0,
            grid=(n_tiles,),
            in_specs=[pl.BlockSpec((tn, P), lambda i: (i, 0)),
                      pl.BlockSpec((tn, P), lambda i: (i, 0))],
            out_specs=[pl.BlockSpec((1, 1), lambda i: (0, 0),
                                    memory_space=pltpu.MemorySpace.SMEM),
                       pl.BlockSpec((1, 1), lambda i: (0, 0),
                                    memory_space=pltpu.MemorySpace.SMEM)],
            scratch_shapes=[pltpu.SMEM((2,), jnp.float32)]),
        compiler_params=pltpu.CompilerParams(
            dimension_semantics=("arbitrary",)),
    )(point_logits, point_labels)
    return bce_sum[0, 0], dice_sum[0, 0]


# --------------------------------------------------------------------------
# Plain-JAX glue: grid_sample-style point sampling, uncertain points, matcher.
# --------------------------------------------------------------------------
def point_sample(inp, coords):
    """inp [N,C,H,W], coords [N,P,2] in [0,1] (x,y). Bilinear, align_corners=False,
    zero padding outside. Returns [N,C,P]."""
    N, C, H, W = inp.shape
    x = coords[..., 0] * W - 0.5
    y = coords[..., 1] * H - 0.5
    x0 = jnp.floor(x)
    y0 = jnp.floor(y)
    x1 = x0 + 1.0
    y1 = y0 + 1.0
    wx1 = x - x0
    wx0 = 1.0 - wx1
    wy1 = y - y0
    wy0 = 1.0 - wy1

    def gather(ix, iy):
        valid = (ix >= 0) & (ix <= W - 1) & (iy >= 0) & (iy <= H - 1)
        ixc = jnp.clip(ix, 0, W - 1).astype(jnp.int32)
        iyc = jnp.clip(iy, 0, H - 1).astype(jnp.int32)
        vals = jax.vmap(lambda img, yy, xx: img[:, yy, xx])(inp, iyc, ixc)  # [N,C,P]
        return vals * valid[:, None, :].astype(inp.dtype)

    v00 = gather(x0, y0)
    v01 = gather(x1, y0)
    v10 = gather(x0, y1)
    v11 = gather(x1, y1)
    out = (v00 * (wx0 * wy0)[:, None, :] + v01 * (wx1 * wy0)[:, None, :]
           + v10 * (wx0 * wy1)[:, None, :] + v11 * (wx1 * wy1)[:, None, :])
    return out


def calculate_uncertainty(logits):
    return -jnp.abs(logits)


def get_uncertain_point_coords_with_randomness(key, coarse_logits, num_points,
                                               oversample_ratio,
                                               importance_sample_ratio):
    N = coarse_logits.shape[0]
    num_sampled = int(num_points * oversample_ratio)
    k1, k2 = jax.random.split(key)
    point_coords = jax.random.uniform(k1, (N, num_sampled, 2), dtype=jnp.float32)
    point_logits = point_sample(coarse_logits, point_coords)        # [N,1,S]
    uncert = calculate_uncertainty(point_logits)[:, 0, :]           # [N,S]
    num_uncertain = int(importance_sample_ratio * num_points)
    num_random = num_points - num_uncertain
    _, idx = jax.lax.top_k(uncert, num_uncertain)
    sel = jnp.take_along_axis(point_coords, idx[..., None], axis=1)  # [N,nu,2]
    if num_random > 0:
        rand_coords = jax.random.uniform(k2, (N, num_random, 2), dtype=jnp.float32)
        sel = jnp.concatenate([sel, rand_coords], axis=1)
    return sel


def simple_matcher(outputs, targets):
    # TODO(synk): Hungarian assignment (scipy.linear_sum_assignment) is an external
    # module and has no Pallas equivalent; deterministic identity matching used.
    inds = []
    for _b, t in enumerate(targets):
        nt = int(t['labels'].shape[0])
        ar = jnp.arange(nt, dtype=jnp.int32)
        inds.append((ar, ar))
    return inds


# --------------------------------------------------------------------------
# Criterion (forward semantics of SetCriterionSpix)
# --------------------------------------------------------------------------
class SetCriterionSpixPallas:
    def __init__(self, num_classes, matcher, weight_dict, eos_coef, losses,
                 num_points, oversample_ratio, importance_sample_ratio,
                 assign_eps=0.01, contrastive_loss=False, contrastive_tau=0.3,
                 high_threshold=0.3, low_threshold=0.05):
        self.num_classes = num_classes
        self.matcher = matcher
        self.weight_dict = weight_dict
        self.eos_coef = eos_coef
        self.losses = losses
        self.num_points = num_points
        self.oversample_ratio = oversample_ratio
        self.importance_sample_ratio = importance_sample_ratio
        self.assign_eps = assign_eps
        self.contrastive_loss = contrastive_loss
        self.contrastive_tau = contrastive_tau
        self.high_threshold = high_threshold
        self.low_threshold = low_threshold
        # deterministic "buffer": empty_weight = ones(C+1), last = eos_coef
        self.empty_weight = jnp.ones((num_classes + 1,), jnp.float32).at[-1].set(eos_coef)

    # ---- permutation helpers ----
    def _get_src_permutation_idx(self, indices):
        batch_idx = jnp.concatenate(
            [jnp.full_like(src, i) for i, (src, _) in enumerate(indices)])
        src_idx = jnp.concatenate([src for src, _ in indices])
        return batch_idx, src_idx

    def _get_tgt_permutation_idx(self, indices):
        batch_idx = jnp.concatenate(
            [jnp.full_like(tgt, i) for i, (_, tgt) in enumerate(indices)])
        tgt_idx = jnp.concatenate([tgt for _, tgt in indices])
        return batch_idx, tgt_idx

    # ---- losses ----
    def loss_labels(self, outputs, targets, indices, num_masks):
        src_logits = outputs['pred_logits']                        # [B,Q,C+1]
        B, Q, Cp1 = src_logits.shape
        batch_idx, src_idx = self._get_src_permutation_idx(indices)
        target_classes_o = jnp.concatenate(
            [t['labels'][J] for t, (_, J) in zip(targets, indices)])
        target_classes = jnp.full((B, Q), self.num_classes, jnp.int32)
        target_classes = target_classes.at[batch_idx, src_idx].set(
            target_classes_o.astype(jnp.int32))
        # classes-first layout (tiny transpose: (B*Q, C+1) -> (C+1, B*Q))
        logits_cn = src_logits.reshape(B * Q, Cp1).T
        tgt_flat = target_classes.reshape(B * Q)
        row_w = self.empty_weight[tgt_flat]
        loss_ce = weighted_cross_entropy_cn(logits_cn, tgt_flat, row_w)
        return {'loss_ce': loss_ce}

    def loss_masks(self, outputs, targets, indices, num_masks, rng):
        src_idx = self._get_src_permutation_idx(indices)
        tgt_idx = self._get_tgt_permutation_idx(indices)
        src_masks = outputs['pred_masks']                         # [B,Q,h,w]
        src_masks = src_masks[src_idx[0], src_idx[1]]             # [N,h,w]
        target_masks = jnp.stack([t['masks'] for t in targets])   # [B,nt,H,W]
        target_masks = target_masks[tgt_idx[0], tgt_idx[1]].astype(src_masks.dtype)
        src_masks = src_masks[:, None]                            # [N,1,h,w]
        target_masks = target_masks[:, None]                      # [N,1,H,W]
        if src_masks.shape[0] == 0:
            return {'loss_mask': jnp.float32(0.0), 'loss_dice': jnp.float32(0.0)}
        point_coords = get_uncertain_point_coords_with_randomness(
            rng, src_masks, self.num_points, self.oversample_ratio,
            self.importance_sample_ratio)
        point_labels = point_sample(target_masks, point_coords)[:, 0, :]
        point_logits = point_sample(src_masks, point_coords)[:, 0, :]
        bce_sum, dice_sum = mask_point_losses(point_logits, point_labels)
        return {'loss_mask': bce_sum / num_masks, 'loss_dice': dice_sum / num_masks}

    # ---- forward ----
    def forward(self, outputs, targets, rng):
        outputs_without_aux = {k: v for k, v in outputs.items()
                               if k in ('pred_logits', 'pred_masks')}
        indices = self.matcher(outputs_without_aux, targets)
        num_masks = float(sum(int(t['labels'].shape[0]) for t in targets))
        num_masks = max(num_masks, 1.0)

        losses = {}
        for loss in self.losses:
            if loss == 'labels':
                losses.update(self.loss_labels(outputs, targets, indices, num_masks))
            elif loss == 'masks':
                losses.update(self.loss_masks(outputs, targets, indices, num_masks, rng))

        target_sem_segs = jnp.stack([t['sem_seg'] for t in targets])   # [B,H,W]
        _ = jnp.stack([t['image'] for t in targets])  # norm_colors (unused: recon losses off)

        if 'pixel_level_logits' in outputs:
            losses['pixel_cls_loss'] = fused_upsample_cross_entropy(
                outputs['pixel_level_logits'], target_sem_segs, ignore_index=255)
        if 'predicitons_class_spix_pixel_cls' in outputs:
            for i, cls_spix in enumerate(outputs['predicitons_class_spix_pixel_cls']):
                losses[f'spix_pixel_cls_loss_{i}'] = fused_upsample_cross_entropy(
                    cls_spix, target_sem_segs, ignore_index=255)
        # TODO(synk): pixel_cluster_contrast_loss and aux_outputs branches omitted
        # (contrastive_loss=False and no aux_outputs in these synthetic outputs).
        return losses


# --------------------------------------------------------------------------
if __name__ == "__main__":
    key = jax.random.PRNGKey(0)
    B, Q, num_classes = 2, 8, 4
    h, w = 16, 16            # predicted mask resolution
    H, W = 32, 32            # ground-truth / sem-seg resolution
    nt = 3                   # targets per image
    num_points = 16
    oversample_ratio = 3
    importance_sample_ratio = 0.75

    ks = jax.random.split(key, 8)
    pred_logits = jax.random.normal(ks[0], (B, Q, num_classes + 1), jnp.float32)
    pred_masks = jax.random.normal(ks[1], (B, Q, h, w), jnp.float32)
    pixel_level_logits = jax.random.normal(ks[2], (B, num_classes, 8, 8), jnp.float32)
    spix_logits = jax.random.normal(ks[3], (B, num_classes, 8, 8), jnp.float32)

    targets = []
    for b in range(B):
        kb = jax.random.fold_in(ks[4], b)
        k1, k2, k3, k4, k5 = jax.random.split(kb, 5)
        labels = jax.random.randint(k1, (nt,), 0, num_classes)
        masks = (jax.random.uniform(k2, (nt, H, W)) > 0.5).astype(jnp.float32)
        sem_seg = jax.random.randint(k3, (H, W), 0, num_classes)
        ignore = jax.random.uniform(k4, (H, W)) < 0.05
        sem_seg = jnp.where(ignore, 255, sem_seg)
        image = jax.random.normal(k5, (3, H, W), jnp.float32)
        targets.append({'labels': labels, 'masks': masks,
                        'sem_seg': sem_seg, 'image': image})

    outputs = {
        'pred_logits': pred_logits,
        'pred_masks': pred_masks,
        'pixel_level_logits': pixel_level_logits,
        'predicitons_class_spix_pixel_cls': [spix_logits],
    }

    criterion = SetCriterionSpixPallas(
        num_classes=num_classes, matcher=simple_matcher,
        weight_dict={'loss_ce': 1.0, 'loss_mask': 1.0, 'loss_dice': 1.0},
        eos_coef=0.1, losses=['labels', 'masks'],
        num_points=num_points, oversample_ratio=oversample_ratio,
        importance_sample_ratio=importance_sample_ratio)

    losses = criterion.forward(outputs, targets, ks[5])
    losses = jax.tree_util.tree_map(jax.block_until_ready, losses)
    for name, val in sorted(losses.items()):
        assert bool(jnp.isfinite(val)), name
    print("KERNEL_OK")
</pallas_src>

<mosaic_0001>
module attributes {stable_mosaic.version = 11 : i64} {
  func.func @_wce_kernel(%arg0: i32, %arg1: memref<5x16xf32, #tpu.memory_space<vmem>>, %arg2: memref<1x16xi32, #tpu.memory_space<vmem>>, %arg3: memref<1x16xf32, #tpu.memory_space<vmem>>, %arg4: memref<1x1xf32, #tpu.memory_space<smem>>, %arg5: memref<1x1xf32, #tpu.memory_space<smem>>, %arg6: memref<2xf32, #tpu.memory_space<smem>>) attributes {dimension_semantics = [#tpu.dimension_semantics<arbitrary>], iteration_bounds = array<i64: 1>, scalar_prefetch = 0 : i64, scratch_operands = 1 : i64, tpu.core_type = #tpu.core_type<tc>, window_params = [{transform_indices = @transform_0, window_bounds = array<i64: 5, 16>}, {transform_indices = @transform_1, window_bounds = array<i64: 1, 16>}, {transform_indices = @transform_2, window_bounds = array<i64: 1, 16>}, {transform_indices = @transform_3, window_bounds = array<i64: 1, 1>}, {transform_indices = @transform_4, window_bounds = array<i64: 1, 1>}]} {
    %c0_i32 = arith.constant 0 : i32
    %0 = arith.cmpi eq, %arg0, %c0_i32 : i32
    %1 = arith.extui %0 : i1 to i32
    %c0_i32_0 = arith.constant 0 : i32
    %2 = arith.cmpi ne, %1, %c0_i32_0 : i32
    scf.if %2 {
      %cst_19 = arith.constant 0.000000e+00 : f32
      %c0_20 = arith.constant 0 : index
      %51 = memref.load %arg6[%c0_20] : memref<2xf32, #tpu.memory_space<smem>>
      memref.store %cst_19, %arg6[%c0_20] : memref<2xf32, #tpu.memory_space<smem>>
      %cst_21 = arith.constant 0.000000e+00 : f32
      %c1_22 = arith.constant 1 : index
      %52 = memref.load %arg6[%c1_22] : memref<2xf32, #tpu.memory_space<smem>>
      memref.store %cst_21, %arg6[%c1_22] : memref<2xf32, #tpu.memory_space<smem>>
    } else {
    }
    %c0 = arith.constant 0 : index
    %c0_1 = arith.constant 0 : index
    %3 = vector.load %arg1[%c0, %c0_1] : memref<5x16xf32, #tpu.memory_space<vmem>>, vector<5x16xf32>
    %c0_2 = arith.constant 0 : index
    %c0_3 = arith.constant 0 : index
    %4 = vector.load %arg2[%c0_2, %c0_3] : memref<1x16xi32, #tpu.memory_space<vmem>>, vector<1x16xi32>
    %c0_4 = arith.constant 0 : index
    %c0_5 = arith.constant 0 : index
    %5 = vector.load %arg3[%c0_4, %c0_5] : memref<1x16xf32, #tpu.memory_space<vmem>>, vector<1x16xf32>
    %cst = arith.constant dense<0xFF800000> : vector<16xf32>
    %6 = vector.multi_reduction <maximumf>, %3, %cst [0] : vector<5x16xf32> to vector<16xf32>
    %7 = vector.shape_cast %6 : vector<16xf32> to vector<1x16xf32>
    %8 = vector.broadcast %7 : vector<1x16xf32> to vector<5x16xf32>
    %9 = arith.subf %3, %8 : vector<5x16xf32>
    %10 = math.exp %9 : vector<5x16xf32>
    %cst_6 = arith.constant dense<0.000000e+00> : vector<16xf32>
    %11 = vector.multi_reduction <add>, %10, %cst_6 [0] : vector<5x16xf32> to vector<16xf32>
    %12 = vector.shape_cast %11 : vector<16xf32> to vector<1x16xf32>
    %13 = math.log %12 : vector<1x16xf32>
    %14 = arith.addf %13, %7 : vector<1x16xf32>
    %15 = tpu.iota {dimensions = array<i32: 0>} : vector<5x16xi32>
    %16 = vector.broadcast %4 : vector<1x16xi32> to vector<5x16xi32>
    %17 = arith.cmpi eq, %15, %16 : vector<5x16xi32>
    %cst_7 = arith.constant 0.000000e+00 : f32
    %18 = vector.broadcast %cst_7 : f32 to vector<5x16xf32>
    %19 = arith.select %17, %3, %18 : vector<5x16xi1>, vector<5x16xf32>
    %cst_8 = arith.constant dense<0.000000e+00> : vector<16xf32>
    %20 = vector.multi_reduction <add>, %19, %cst_8 [0] : vector<5x16xf32> to vector<16xf32>
    %21 = vector.shape_cast %20 : vector<16xf32> to vector<1x16xf32>
    %22 = arith.subf %14, %21 : vector<1x16xf32>
    %23 = tpu.iota {dimensions = array<i32: 1>} : vector<1x16xi32>
    %c16_i32 = arith.constant 16 : i32
    %24 = arith.muli %arg0, %c16_i32 : i32
    %25 = vector.broadcast %24 : i32 to vector<1x16xi32>
    %26 = arith.addi %23, %25 : vector<1x16xi32>
    %c16_i32_9 = arith.constant 16 : i32
    %27 = vector.broadcast %c16_i32_9 : i32 to vector<1x16xi32>
    %28 = arith.cmpi slt, %26, %27 : vector<1x16xi32>
    %cst_10 = arith.constant 0.000000e+00 : f32
    %29 = vector.broadcast %cst_10 : f32 to vector<1x16xf32>
    %30 = arith.select %28, %5, %29 : vector<1x16xi1>, vector<1x16xf32>
    %c0_11 = arith.constant 0 : index
    %31 = memref.load %arg6[%c0_11] : memref<2xf32, #tpu.memory_space<smem>>
    %32 = arith.mulf %30, %22 : vector<1x16xf32>
    %cst_12 = arith.constant 0.000000e+00 : f32
    %33 = vector.broadcast %cst_12 : f32 to vector<1x16xf32>
    %34 = arith.select %28, %32, %33 : vector<1x16xi1>, vector<1x16xf32>
    %35 = vector.shape_cast %34 : vector<1x16xf32> to vector<1x1x16xf32>
    %cst_13 = arith.constant dense<0.000000e+00> : vector<1xf32>
    %36 = vector.multi_reduction <add>, %35, %cst_13 [1, 2] : vector<1x1x16xf32> to vector<1xf32>
    %37 = vector.shape_cast %36 : vector<1xf32> to vector<1x1x1xf32>
    %38 = vector.extract %37[0, 0, 0] : f32 from vector<1x1x1xf32>
    %39 = arith.addf %31, %38 : f32
    %c0_14 = arith.constant 0 : index
    %40 = memref.load %arg6[%c0_14] : memref<2xf32, #tpu.memory_space<smem>>
    memref.store %39, %arg6[%c0_14] : memref<2xf32, #tpu.memory_space<smem>>
    %c1 = arith.constant 1 : index
    %41 = memref.load %arg6[%c1] : memref<2xf32, #tpu.memory_space<smem>>
    %42 = vector.shape_cast %30 : vector<1x16xf32> to vector<1x1x16xf32>
    %cst_15 = arith.constant dense<0.000000e+00> : vector<1xf32>
    %43 = vector.multi_reduction <add>, %42, %cst_15 [1, 2] : vector<1x1x16xf32> to vector<1xf32>
    %44 = vector.shape_cast %43 : vector<1xf32> to vector<1x1x1xf32>
    %45 = vector.extract %44[0, 0, 0] : f32 from vector<1x1x1xf32>
    %46 = arith.addf %41, %45 : f32
    %c1_16 = arith.constant 1 : index
    %47 = memref.load %arg6[%c1_16] : memref<2xf32, #tpu.memory_space<smem>>
    memref.store %46, %arg6[%c1_16] : memref<2xf32, #tpu.memory_space<smem>>
    %c0_i32_17 = arith.constant 0 : i32
    %48 = arith.cmpi eq, %arg0, %c0_i32_17 : i32
    %49 = arith.extui %48 : i1 to i32
    %c0_i32_18 = arith.constant 0 : i32
    %50 = arith.cmpi ne, %49, %c0_i32_18 : i32
    scf.if %50 {
      %c0_19 = arith.constant 0 : index
      %51 = memref.load %arg6[%c0_19] : memref<2xf32, #tpu.memory_space<smem>>
      %c0_20 = arith.constant 0 : index
      %c0_21 = arith.constant 0 : index
      %52 = memref.load %arg4[%c0_20, %c0_21] : memref<1x1xf32, #tpu.memory_space<smem>>
      memref.store %51, %arg4[%c0_20, %c0_21] : memref<1x1xf32, #tpu.memory_space<smem>>
      %c1_22 = arith.constant 1 : index
      %53 = memref.load %arg6[%c1_22] : memref<2xf32, #tpu.memory_space<smem>>
      %c0_23 = arith.constant 0 : index
      %c0_24 = arith.constant 0 : index
      %54 = memref.load %arg5[%c0_23, %c0_24] : memref<1x1xf32, #tpu.memory_space<smem>>
      memref.store %53, %arg5[%c0_23, %c0_24] : memref<1x1xf32, #tpu.memory_space<smem>>
    } else {
    }
    return
  }
  func.func @transform_0(%arg0: i32) -> (i32, i32) {
    %c0_i32 = arith.constant 0 : i32
    %c0_i32_0 = arith.constant 0 : i32
    return %c0_i32, %arg0 : i32, i32
  }
  func.func @transform_1(%arg0: i32) -> (i32, i32) {
    %c0_i32 = arith.constant 0 : i32
    %c0_i32_0 = arith.constant 0 : i32
    return %c0_i32, %arg0 : i32, i32
  }
  func.func @transform_2(%arg0: i32) -> (i32, i32) {
    %c0_i32 = arith.constant 0 : i32
    %c0_i32_0 = arith.constant 0 : i32
    return %c0_i32, %arg0 : i32, i32
  }
  func.func @transform_3(%arg0: i32) -> (i32, i32) {
    %c0_i32 = arith.constant 0 : i32
    %c0_i32_0 = arith.constant 0 : i32
    %c0_i32_1 = arith.constant 0 : i32
    return %c0_i32, %c0_i32_0 : i32, i32
  }
  func.func @transform_4(%arg0: i32) -> (i32, i32) {
    %c0_i32 = arith.constant 0 : i32
    %c0_i32_0 = arith.constant 0 : i32
    %c0_i32_1 = arith.constant 0 : i32
    return %c0_i32, %c0_i32_0 : i32, i32
  }
}

</mosaic_0001>

<bundles_post_ra>
// kernel: tpu_custom_call.1
= control target key start
LH: loop header
LB: loop body
LE: loop exit
PB: predicated region body
PF: predicated region fallthrough
CT: control target
= control target key end

     0   :  { %10 = vsyncpa [#allocation4], 0  ;;  %s253_s0 = inlined_call_operand.hbm [shape: f32[5,16], index: 0, kind: input, shape index: {}]   ;;  %s254_s1 = inlined_call_operand.vmem [shape: s32[1,16], index: 1, kind: input, shape index: {}]   ;;  %s255_s2 = inlined_call_operand.vmem [shape: f32[1,16], index: 2, kind: input, shape index: {}]   ;;  %s256_s3 = inlined_call_operand.hbm [shape: f32[1,1], index: 3, kind: output, shape index: {0}]   ;;  %s257_s4 = inlined_call_operand.hbm [shape: f32[1,1], index: 4, kind: output, shape index: {1}]  }
   0x1   :  { %11 = vsyncpa [#allocation5], 0 }
   0x2   :  { %12 = vsyncpa [#allocation8], 0  ;;  %s207_s15 = smov [#allocation3]  }
   0x3   :  { %s19_s16 = sshll.u32 %s207_s15, 4  ;;  %s20_s16 = int_to_ptr.vmem [resolvable:$true] %s19_s16 }
   0x4   :  { %s173_s17 = scalar_lea.vmem %s20_s16, 128  ;;  %p178_p1 = scmp.lt.s32.totalorder %s20_s16, %s20_s16 }
   0x5   :  { %p174_p0 = scmp.ne.s32.totalorder %s20_s16, %s173_s17  ;;  %p179_p2 = scmp.lt.s32.totalorder %s173_s17, %s173_s17 }
   0x7   :  { %p180_p3 = por %p179_p2, %p178_p1 }
   0x9   :  { %p181_p4 = pnand %p180_p3, %p174_p0 }
   0xb   :  { %184 = shalt.err (!%p181_p4)
}
   0xc   :  { %22 = dma.hbm_to_vmem [thread:$0]  %s253_s0, 128, %s20_s16, [#allocation4]  }
   0xd   :  { %201 = dma.done.wait [#allocation4], 128  }
   0xe   :  { %202 = vsyncadd [#allocation4], 4294967168  ;;  %vm41_vm0 = vcmask 126976   ;;  %v38_v0 = vld [vmem:[#allocation3] sm:$0x1f]  ;;  %v62_v10 = vlaneseq  ;;  %vm88_vm3 = vcmask 122880  }
   0xf   :  { %v42_v1 = vsel %vm41_vm0, %v38_v0, -inf  ;;  %v151_v12 = vld [vmem:[%s254_s1] ss:$0 sm:$0xff]  ;;  %s208_s22 = smov [#allocation6]   ;;  %s209_s26 = smov [#allocation7]  }
  0x10   :  { %v43_v2 = vrot.slane %v42_v1, 4  ;;  %v63_v11 = vshrl.u32 %v62_v10, 7  ;;  %v79_v28 = vand.u32 127, %v62_v10  ;;  %v40_v30 = vld [vmem:[%s255_s2] sm:$0x1] }
  0x12   :  { %v44_v3 = vmax.f32 %v42_v1, %v43_v2  ;;  %vm68_vm1 = vcmp.eq.s32.totalorder %v63_v11, %v151_v12  ;;  %vm83_vm2 = vcmp.lt.s32.totalorder %v79_v28, 16 }
  0x13   :  { %v69_v16 = vsel %vm68_vm1, %v38_v0, 0.0  ;;  %v84_v34 = vsel %vm83_vm2, %v40_v30, 0.0 }
  0x14   :  { %v45_v4 = vrot.slane %v44_v3, 2  ;;  %v70_v18 = vsel %vm41_vm0, %v69_v16, 0.0  ;;  %v103_v39 = vsel %vm88_vm3, %v84_v34, 0.0 }
  0x15   :  { %v71_v21 = vrot.slane %v70_v18, 4 }
  0x16   :  { %v46_v5 = vmax.f32 %v44_v3, %v45_v4 }
  0x17   :  { %v72_v24 = vadd.f32 %v71_v21, %v70_v18 }
  0x18   :  { %v47_v6 = vrot.slane %v46_v5, 1 }
  0x19   :  { %v73_v25 = vrot.slane %v72_v24, 2 }
  0x1a   :  { %v48_v7 = vmax.f32 %v46_v5, %v47_v6 }
  0x1b   :  { %v74_v26 = vadd.f32 %v73_v25, %v72_v24 }
  0x1c   :  { %v49_v8 = vsub.f32 %v38_v0, %v48_v7 }
  0x1d   :  { %v75_v27 = vrot.slane %v74_v26, 1 }
  0x1e   :  { %v50_v9 = vmul.f32 1.442695, %v49_v8 }
  0x1f   :  { %v76_v32 = vadd.f32 %v75_v27, %v74_v26 }
  0x20   :  { %161 = vpow2.f32 %v50_v9 }
  0x2d   :  { %v162_v13 = vpop.eup %161 }
  0x2e   :  { %v52_v14 = vsel %vm41_vm0, %v162_v13, 0.0 }
  0x2f   :  { %v53_v15 = vrot.slane %v52_v14, 4 }
  0x31   :  { %v54_v17 = vadd.f32 %v53_v15, %v52_v14 }
  0x33   :  { %v55_v19 = vrot.slane %v54_v17, 2 }
  0x35   :  { %v56_v20 = vadd.f32 %v55_v19, %v54_v17 }
  0x37   :  { %v57_v22 = vrot.slane %v56_v20, 1 }
  0x39   :  { %v58_v23 = vadd.f32 %v57_v22, %v56_v20 }
  0x3b   :  { %163 = vlog2.f32 %v58_v23 }
  0x48   :  { %v164_v29 = vpop.eup %163 }
  0x49   :  { %v60_v31 = vmul.f32 0.6931472, %v164_v29 }
  0x4b   :  { %v61_v33 = vadd.f32 %v60_v31, %v48_v7 }
  0x4d   :  { %v77_v35 = vsub.f32 %v61_v33, %v76_v32 }
  0x4f   :  { %v86_v36 = vmul.f32 %v84_v34, %v77_v35 }
  0x51   :  { %v87_v37 = vsel %vm83_vm2, %v86_v36, 0.0 }
  0x52   :  { %v89_v38 = vsel %vm88_vm3, %v87_v37, 0.0 }
  0x53   :  { %90 = vadd.xlane.f32.xlu0 %v89_v38 }
  0x57   :  { %104 = vadd.xlane.f32.xlu0 %v103_v39 }
  0xdc   :  { %v91_v40 = vpop.xlane.xlu0 %90 }
  0xdd   :  { %v92_v41 = vrot.slane %v91_v40, 4 }
  0xdf   :  { %v93_v42 = vadd.f32 %v92_v41, %v91_v40 }
  0xe0   :  { %v105_v43 = vpop.xlane.xlu0 %104 }
  0xe1   :  { %v94_v44 = vrot.slane %v93_v42, 2  ;;  %v106_v45 = vrot.slane %v105_v43, 4 }
  0xe3   :  { %v107_v46 = vadd.f32 %v106_v45, %v105_v43  ;;  %v95_v47 = vadd.f32 %v94_v44, %v93_v42 }
  0xe5   :  { %v108_v48 = vrot.slane %v107_v46, 2  ;;  %v96_v49 = vrot.slane %v95_v47, 1 }
  0xe7   :  { %v109_v50 = vadd.f32 %v108_v48, %v107_v46  ;;  %v97_v51 = vadd.f32 %v96_v49, %v95_v47 }
  0xe9   :  { %154 = vpush %v97_v51  ;;  %v110_v52 = vrot.slane %v109_v50, 1 }
  0xeb   :  { %v111_v53 = vadd.f32 %v110_v52, %v109_v50 }
  0xed   :  { %156 = vpush %v111_v53 }
 0x11a   :  { %s155_s2 = spop %154 }
 0x11b   :  { %121 = sst [smem:[#allocation6]] %s155_s2 }
 0x11c   :  { %132 = dma.smem_to_hbm %s208_s22, 16, %s256_s3, [#allocation5]  }
 0x11e   :  { %s157_s25 = spop %156 }
 0x11f   :  { %124 = sst [smem:[#allocation7]] %s157_s25 }
 0x120   :  { %140 = dma.smem_to_hbm %s209_s26, 16, %s257_s4, [#allocation8]  }
 0x121   :  { %203 = dma.done.wait [#allocation5], 16  }
 0x122   :  { %204 = vsyncadd [#allocation5], 4294967280 }
 0x123   :  { %205 = dma.done.wait [#allocation8], 16  }
 0x124   :  { %206 = vsyncadd [#allocation8], 4294967280 }
 0x125   :  { %147 = sfence }
 0x126   :  { %148 = vsyncpa [#allocation4], 1 }
 0x127   :  { %149 = vsyncpa [#allocation5], 1 }
 0x128   :  { %150 = vsyncpa [#allocation8], 1 }

</bundles_post_ra>
